<compile_context>
chip_gen: v6e
topology: v6e:2x2x1
jax: 0.10.0
libtpu: 0.0.40
codegen_flags: <defaults>
</compile_context>

<pallas_src>
import functools

import numpy as np
import jax
import jax.numpy as jnp
from jax import lax
from jax.experimental import pallas as pl
from jax.experimental.pallas import tpu as pltpu


def _cdiv(a, b):
    return -(-a // b)


def _round_up(x, m):
    return _cdiv(x, m) * m


def _pow_pos(x, g):
    """x**g for x >= 0 with trace-time g; gamma == 0.5 (module default) -> sqrt."""
    if g == 0.5:
        return jnp.sqrt(x)
    if g == 1.0:
        return x
    if g == 2.0:
        return x * x
    return jnp.exp(g * jnp.log(x))      # x == 0 -> exp(-inf) = 0 for g > 0


def _ufl_kernel(yt_ref, yp_ref, out_ref,
                s_tp0, s_tp1, s_yt0, s_yt1, s_yp0, s_yp1, s_q, s_bt,
                *, n_batch, n_class, n_lanes, block_s, has_pad,
                weight, delta, gamma):
    eps = 1e-10
    step = pl.program_id(0)
    accs = (s_tp0, s_tp1, s_yt0, s_yt1, s_yp0, s_yp1, s_q, s_bt)

    @pl.when(step == 0)
    def _():
        for r in accs:
            r[...] = jnp.zeros_like(r)

    # ---- tiny (1, block_s) lane bookkeeping: class id (+ validity) ----------
    lane = jax.lax.broadcasted_iota(jnp.int32, (1, block_s), 1) + step * block_s
    if (n_class & (n_class - 1)) == 0:                 # power-of-two class count
        cls = jnp.bitwise_and(lane, n_class - 1)
    else:
        cls = lane % n_class                           # general C fallback
    is0 = cls == 0
    is1 = cls == 1
    if has_pad:
        valid = lane < n_lanes
        is0 = jnp.logical_and(is0, valid)
        is1 = jnp.logical_and(is1, valid)
    m0 = is0.astype(jnp.float32)
    m1 = is1.astype(jnp.float32)

    # ---- full-width loads (bf16 accepted; math/accumulation in f32) ---------
    yt = yt_ref[...].astype(jnp.float32)
    yp = yp_ref[...].astype(jnp.float32)
    if has_pad:
        # Padded lanes of the partial last block contain garbage (possibly NaN):
        # select them away (NaN-safe), never multiply them.
        yt = jnp.where(valid, yt, 0.0)
        yp = jnp.where(valid, yp, 1.0)     # -> log=0, (1-yp)^g=0, so ce/back terms = 0
    yp = jnp.clip(yp, eps, 1.0 - eps)      # torch.clip(y_pred, eps, 1 - eps)

    t = yt * yp                            # y_true * y_pred
    q = yt * jnp.log(yp)                   # == -cross_entropy (sign fixed in epilogue)
    bt = _pow_pos(1.0 - yp, gamma) * (1.0 + q)   # (1 - yp)^g * (1 - ce)

    # Constant scalings (delta, 1-delta, weight) and fn/fp are applied /
    # reconstructed only in the epilogue.
    s_tp0[...] += jnp.sum(m0 * t, axis=-1, keepdims=True)
    s_tp1[...] += jnp.sum(m1 * t, axis=-1, keepdims=True)
    s_yt0[...] += jnp.sum(m0 * yt, axis=-1, keepdims=True)
    s_yt1[...] += jnp.sum(m1 * yt, axis=-1, keepdims=True)
    s_yp0[...] += jnp.sum(m0 * yp, axis=-1, keepdims=True)
    s_yp1[...] += jnp.sum(m1 * yp, axis=-1, keepdims=True)
    s_q[...] += jnp.sum(q, axis=-1, keepdims=True)
    s_bt[...] += jnp.sum(bt, axis=-1, keepdims=True)

    # ---- O(N) epilogue on the last reduction step only ----------------------
    @pl.when(step == pl.num_programs(0) - 1)
    def _():
        def dice(tp, syt, syp):
            fn = syt - tp                  # sum(yt) - tp  == sum(yt * (1 - yp))
            fp = syp - tp                  # sum(yp) - tp  == sum((1 - yt) * yp)
            return (tp + eps) / (tp + delta * fn + (1.0 - delta) * fp + eps)

        d0 = dice(s_tp0[...], s_yt0[...], s_yp0[...])      # (N, 1)
        d1 = dice(s_tp1[...], s_yt1[...], s_yp1[...])
        back_dice = 1.0 - d0
        x = 1.0 - d1
        # (1 - d1) * (1 - d1)^(-gamma); NaN at d1 == 1 (0 * inf), same as torch.
        if gamma == 0.5:
            fore_dice = x / jnp.sqrt(x)
        else:
            fore_dice = x * jnp.exp(-gamma * jnp.log(x))
        ftl = (jnp.sum(back_dice) + jnp.sum(fore_dice)) / (2.0 * n_batch)

        sum_ce = -jnp.sum(s_q[...])
        sum_back = jnp.sum(s_bt[...])
        fl = ((1.0 - delta) * sum_back + delta * sum_ce) / float(n_batch * n_lanes)

        loss = weight * ftl + (1.0 - weight) * fl
        out_ref[...] = jnp.full((1, 1), loss, dtype=jnp.float32)


def unified_focal_loss_pallas(y_pred, y_true, weight=0.5, delta=0.6, gamma=0.5,
                              block_s=None):
    """UnifiedFocalLoss().forward(input=y_pred, target=y_true) -> scalar float32."""
    shape = y_pred.shape
    assert y_true.shape == shape
    # identify_axis: only 4D (N,H,W,C) / 5D (N,D,H,W,C) channels-last tensors.
    assert len(shape) in (4, 5), "Metric: Shape of tensor is neither 2D or 3D."
    n_batch = int(shape[0])
    n_class = int(shape[-1])
    assert n_class >= 2, "asymmetric losses index dice classes 0 and 1"
    n_lanes = int(np.prod(shape[1:]))                      # spatial * channels

    # Free, contiguous reshape (N, *spatial, C) -> (N, S*C): no transpose / pad /
    # dtype-cast HBM round trip before the kernel runs.
    yt2 = y_true.reshape(n_batch, n_lanes)
    yp2 = y_pred.reshape(n_batch, n_lanes)

    # Block sizing: ~2 MiB per input per block (2 inputs x 2 pipeline buffers
    # ~= 8 MiB) -- within the default scoped-VMEM limit of every generation
    # (16 MiB v5e, 32 MiB v6e, 32-of-64 MiB v7x) -- then rebalanced so trailing
    # partial-block waste stays small.
    if block_s is None:
        row_bytes = _round_up(n_batch, 8) * 4              # f32 rows, sublane-padded
        block_s = max(128, (2 * 1024 * 1024) // row_bytes)
        n_blk = _cdiv(n_lanes, block_s)
        block_s = _cdiv(n_lanes, n_blk)
    block_s = min(_round_up(block_s, 128), _round_up(n_lanes, 128))
    num_blocks = _cdiv(n_lanes, block_s)
    has_pad = num_blocks * block_s != n_lanes

    kernel = functools.partial(
        _ufl_kernel, n_batch=n_batch, n_class=n_class, n_lanes=n_lanes,
        block_s=block_s, has_pad=has_pad,
        weight=float(weight), delta=float(delta), gamma=float(gamma))

    total = n_batch * n_lanes
    cost = pl.CostEstimate(flops=24 * total, transcendentals=2 * total,
                           bytes_accessed=2 * total * y_pred.dtype.itemsize + 4)

    out = pl.pallas_call(
        kernel,
        out_shape=jax.ShapeDtypeStruct((1, 1), jnp.float32),
        grid=(num_blocks,),
        in_specs=[
            pl.BlockSpec((n_batch, block_s), lambda s: (0, s)),   # y_true
            pl.BlockSpec((n_batch, block_s), lambda s: (0, s)),   # y_pred
        ],
        out_specs=pl.BlockSpec((1, 1), lambda s: (0, 0)),
        scratch_shapes=[pltpu.VMEM((n_batch, 1), jnp.float32)] * 8,
        compiler_params=pltpu.CompilerParams(
            dimension_semantics=("arbitrary",)),
        cost_estimate=cost,
    )(yt2, yp2)
    return out[0, 0]


def unified_focal_loss_ref(y_pred, y_true, weight=0.5, delta=0.6, gamma=0.5):
    """NumPy reference mirroring the PyTorch code (float64, no torch needed)."""
    eps = 1e-10
    yp = np.clip(np.asarray(y_pred, np.float64), eps, 1.0 - eps)
    yt = np.asarray(y_true, np.float64)
    axis = tuple(range(1, yt.ndim - 1))          # identify_axis: [1,2] / [1,2,3]

    tp = (yt * yp).sum(axis=axis)
    fn = (yt * (1.0 - yp)).sum(axis=axis)
    fp = ((1.0 - yt) * yp).sum(axis=axis)
    dice = (tp + eps) / (tp + delta * fn + (1.0 - delta) * fp + eps)
    back_dice = 1.0 - dice[:, 0]
    fore_dice = (1.0 - dice[:, 1]) * (1.0 - dice[:, 1]) ** (-gamma)
    ftl = np.mean(np.stack([back_dice, fore_dice], axis=-1))

    ce = -yt * np.log(yp)
    back_ce = (1.0 - delta) * (1.0 - yp) ** gamma * (1.0 - ce)
    fore_ce = delta * ce
    fl = np.mean(back_ce + fore_ce)
    return weight * ftl + (1.0 - weight) * fl


def _check(y_pred, y_true, block_s):
    loss = jax.block_until_ready(
        unified_focal_loss_pallas(y_pred, y_true, block_s=block_s))
    ref = unified_focal_loss_ref(np.asarray(y_pred), np.asarray(y_true))
    assert np.isfinite(float(loss))
    np.testing.assert_allclose(float(loss), float(ref), rtol=2e-3, atol=2e-3)


if __name__ == "__main__":
    key = jax.random.PRNGKey(0)
    k1, k2, k3, k4 = jax.random.split(key, 4)

    # Test 1: (N,H,W,C)=(2,16,16,2), explicit block_s=128 -> 4 reduction steps,
    # exercising the resident-accumulator path (no partial block).
    shape = (2, 16, 16, 2)
    y_pred = jax.nn.softmax(jax.random.normal(k1, shape, dtype=jnp.float32), axis=-1)
    labels = (jax.random.uniform(k2, shape[:-1]) > 0.5).astype(jnp.int32)
    y_true = jax.nn.one_hot(labels, shape[-1], dtype=jnp.float32)
    _check(y_pred, y_true, block_s=128)

    # Test 2/3: odd spatial (7x9) with C=4 -> the last block is partial, exercising
    # the in-kernel lane-validity masking (no wrapper-side padding copy), both with
    # the default budget-based block size (1 block) and with block_s=128 (2 blocks).
    shape2 = (2, 7, 9, 4)
    y_pred2 = jax.nn.softmax(jax.random.normal(k3, shape2, dtype=jnp.float32), axis=-1)
    labels2 = jax.random.randint(k4, shape2[:-1], 0, shape2[-1])
    y_true2 = jax.nn.one_hot(labels2, shape2[-1], dtype=jnp.float32)
    _check(y_pred2, y_true2, block_s=None)
    _check(y_pred2, y_true2, block_s=128)

    print("KERNEL_OK")
</pallas_src>

<mosaic_0001>
module attributes {stable_mosaic.version = 11 : i64} {
  func.func @_ufl_kernel(%arg0: i32, %arg1: memref<2x128xf32, #tpu.memory_space<vmem>>, %arg2: memref<2x128xf32, #tpu.memory_space<vmem>>, %arg3: memref<1x1xf32, #tpu.memory_space<vmem>>, %arg4: memref<2x1xf32, #tpu.memory_space<vmem>>, %arg5: memref<2x1xf32, #tpu.memory_space<vmem>>, %arg6: memref<2x1xf32, #tpu.memory_space<vmem>>, %arg7: memref<2x1xf32, #tpu.memory_space<vmem>>, %arg8: memref<2x1xf32, #tpu.memory_space<vmem>>, %arg9: memref<2x1xf32, #tpu.memory_space<vmem>>, %arg10: memref<2x1xf32, #tpu.memory_space<vmem>>, %arg11: memref<2x1xf32, #tpu.memory_space<vmem>>) attributes {dimension_semantics = [#tpu.dimension_semantics<arbitrary>], iteration_bounds = array<i64: 4>, scalar_prefetch = 0 : i64, scratch_operands = 8 : i64, tpu.core_type = #tpu.core_type<tc>, window_params = [{transform_indices = @transform_0, window_bounds = array<i64: 2, 128>}, {transform_indices = @transform_1, window_bounds = array<i64: 2, 128>}, {pipeline_mode = #tpu.pipeline_mode<synchronous>, transform_indices = @transform_2, window_bounds = array<i64: 1, 1>}]} {
    %c0_i32 = arith.constant 0 : i32
    %0 = arith.cmpi eq, %arg0, %c0_i32 : i32
    %1 = arith.extui %0 : i1 to i32
    %c0_i32_0 = arith.constant 0 : i32
    %2 = arith.cmpi ne, %1, %c0_i32_0 : i32
    scf.if %2 {
      %cst_50 = arith.constant 0.000000e+00 : f32
      %87 = vector.broadcast %cst_50 : f32 to vector<2x1xf32>
      %c0_51 = arith.constant 0 : index
      %c0_52 = arith.constant 0 : index
      %88 = vector.load %arg4[%c0_51, %c0_52] : memref<2x1xf32, #tpu.memory_space<vmem>>, vector<2x1xf32>
      tpu.vector_store %arg4[%c0_51, %c0_52], %87 {strides = array<i32>} : memref<2x1xf32, #tpu.memory_space<vmem>>, vector<2x1xf32>,
      %cst_53 = arith.constant 0.000000e+00 : f32
      %89 = vector.broadcast %cst_53 : f32 to vector<2x1xf32>
      %c0_54 = arith.constant 0 : index
      %c0_55 = arith.constant 0 : index
      %90 = vector.load %arg5[%c0_54, %c0_55] : memref<2x1xf32, #tpu.memory_space<vmem>>, vector<2x1xf32>
      tpu.vector_store %arg5[%c0_54, %c0_55], %89 {strides = array<i32>} : memref<2x1xf32, #tpu.memory_space<vmem>>, vector<2x1xf32>,
      %cst_56 = arith.constant 0.000000e+00 : f32
      %91 = vector.broadcast %cst_56 : f32 to vector<2x1xf32>
      %c0_57 = arith.constant 0 : index
      %c0_58 = arith.constant 0 : index
      %92 = vector.load %arg6[%c0_57, %c0_58] : memref<2x1xf32, #tpu.memory_space<vmem>>, vector<2x1xf32>
      tpu.vector_store %arg6[%c0_57, %c0_58], %91 {strides = array<i32>} : memref<2x1xf32, #tpu.memory_space<vmem>>, vector<2x1xf32>,
      %cst_59 = arith.constant 0.000000e+00 : f32
      %93 = vector.broadcast %cst_59 : f32 to vector<2x1xf32>
      %c0_60 = arith.constant 0 : index
      %c0_61 = arith.constant 0 : index
      %94 = vector.load %arg7[%c0_60, %c0_61] : memref<2x1xf32, #tpu.memory_space<vmem>>, vector<2x1xf32>
      tpu.vector_store %arg7[%c0_60, %c0_61], %93 {strides = array<i32>} : memref<2x1xf32, #tpu.memory_space<vmem>>, vector<2x1xf32>,
      %cst_62 = arith.constant 0.000000e+00 : f32
      %95 = vector.broadcast %cst_62 : f32 to vector<2x1xf32>
      %c0_63 = arith.constant 0 : index
      %c0_64 = arith.constant 0 : index
      %96 = vector.load %arg8[%c0_63, %c0_64] : memref<2x1xf32, #tpu.memory_space<vmem>>, vector<2x1xf32>
      tpu.vector_store %arg8[%c0_63, %c0_64], %95 {strides = array<i32>} : memref<2x1xf32, #tpu.memory_space<vmem>>, vector<2x1xf32>,
      %cst_65 = arith.constant 0.000000e+00 : f32
      %97 = vector.broadcast %cst_65 : f32 to vector<2x1xf32>
      %c0_66 = arith.constant 0 : index
      %c0_67 = arith.constant 0 : index
      %98 = vector.load %arg9[%c0_66, %c0_67] : memref<2x1xf32, #tpu.memory_space<vmem>>, vector<2x1xf32>
      tpu.vector_store %arg9[%c0_66, %c0_67], %97 {strides = array<i32>} : memref<2x1xf32, #tpu.memory_space<vmem>>, vector<2x1xf32>,
      %cst_68 = arith.constant 0.000000e+00 : f32
      %99 = vector.broadcast %cst_68 : f32 to vector<2x1xf32>
      %c0_69 = arith.constant 0 : index
      %c0_70 = arith.constant 0 : index
      %100 = vector.load %arg10[%c0_69, %c0_70] : memref<2x1xf32, #tpu.memory_space<vmem>>, vector<2x1xf32>
      tpu.vector_store %arg10[%c0_69, %c0_70], %99 {strides = array<i32>} : memref<2x1xf32, #tpu.memory_space<vmem>>, vector<2x1xf32>,
      %cst_71 = arith.constant 0.000000e+00 : f32
      %101 = vector.broadcast %cst_71 : f32 to vector<2x1xf32>
      %c0_72 = arith.constant 0 : index
      %c0_73 = arith.constant 0 : index
      %102 = vector.load %arg11[%c0_72, %c0_73] : memref<2x1xf32, #tpu.memory_space<vmem>>, vector<2x1xf32>
      tpu.vector_store %arg11[%c0_72, %c0_73], %101 {strides = array<i32>} : memref<2x1xf32, #tpu.memory_space<vmem>>, vector<2x1xf32>,
    } else {
    }
    %3 = tpu.iota {dimensions = array<i32: 1>} : vector<1x128xi32>
    %c128_i32 = arith.constant 128 : i32
    %4 = arith.muli %arg0, %c128_i32 : i32
    %5 = vector.broadcast %4 : i32 to vector<1x128xi32>
    %6 = arith.addi %3, %5 : vector<1x128xi32>
    %c1_i32 = arith.constant 1 : i32
    %7 = vector.broadcast %c1_i32 : i32 to vector<1x128xi32>
    %8 = arith.andi %6, %7 : vector<1x128xi32>
    %c0_i32_1 = arith.constant 0 : i32
    %9 = vector.broadcast %c0_i32_1 : i32 to vector<1x128xi32>
    %10 = arith.cmpi eq, %8, %9 : vector<1x128xi32>
    %c1_i32_2 = arith.constant 1 : i32
    %11 = vector.broadcast %c1_i32_2 : i32 to vector<1x128xi32>
    %12 = arith.cmpi eq, %8, %11 : vector<1x128xi32>
    %13 = arith.extui %10 : vector<1x128xi1> to vector<1x128xi32>
    %14 = arith.sitofp %13 : vector<1x128xi32> to vector<1x128xf32>
    %15 = arith.extui %12 : vector<1x128xi1> to vector<1x128xi32>
    %16 = arith.sitofp %15 : vector<1x128xi32> to vector<1x128xf32>
    %c0 = arith.constant 0 : index
    %c0_3 = arith.constant 0 : index
    %17 = vector.load %arg1[%c0, %c0_3] : memref<2x128xf32, #tpu.memory_space<vmem>>, vector<2x128xf32>
    %c0_4 = arith.constant 0 : index
    %c0_5 = arith.constant 0 : index
    %18 = vector.load %arg2[%c0_4, %c0_5] : memref<2x128xf32, #tpu.memory_space<vmem>>, vector<2x128xf32>
    %cst = arith.constant 1.000000e-10 : f32
    %cst_6 = arith.constant 1.000000e+00 : f32
    %19 = vector.broadcast %cst : f32 to vector<2x128xf32>
    %20 = arith.maximumf %19, %18 : vector<2x128xf32>
    %21 = vector.broadcast %cst_6 : f32 to vector<2x128xf32>
    %22 = arith.minimumf %21, %20 : vector<2x128xf32>
    %23 = arith.mulf %17, %22 : vector<2x128xf32>
    %24 = math.log %22 : vector<2x128xf32>
    %25 = arith.mulf %17, %24 : vector<2x128xf32>
    %cst_7 = arith.constant 1.000000e+00 : f32
    %26 = vector.broadcast %cst_7 : f32 to vector<2x128xf32>
    %27 = arith.subf %26, %22 : vector<2x128xf32>
    %28 = math.sqrt %27 : vector<2x128xf32>
    %cst_8 = arith.constant 1.000000e+00 : f32
    %29 = vector.broadcast %cst_8 : f32 to vector<2x128xf32>
    %30 = arith.addf %29, %25 : vector<2x128xf32>
    %31 = arith.mulf %28, %30 : vector<2x128xf32>
    %c0_9 = arith.constant 0 : index
    %c0_10 = arith.constant 0 : index
    %32 = vector.load %arg4[%c0_9, %c0_10] : memref<2x1xf32, #tpu.memory_space<vmem>>, vector<2x1xf32>
    %33 = vector.broadcast %14 : vector<1x128xf32> to vector<2x128xf32>
    %34 = arith.mulf %33, %23 : vector<2x128xf32>
    %cst_11 = arith.constant dense<0.000000e+00> : vector<2xf32>
    %35 = vector.multi_reduction <add>, %34, %cst_11 [1] : vector<2x128xf32> to vector<2xf32>
    %36 = vector.shape_cast %35 : vector<2xf32> to vector<2x1xf32>
    %37 = arith.addf %32, %36 : vector<2x1xf32>
    %c0_12 = arith.constant 0 : index
    %c0_13 = arith.constant 0 : index
    %38 = vector.load %arg4[%c0_12, %c0_13] : memref<2x1xf32, #tpu.memory_space<vmem>>, vector<2x1xf32>
    tpu.vector_store %arg4[%c0_12, %c0_13], %37 {strides = array<i32>} : memref<2x1xf32, #tpu.memory_space<vmem>>, vector<2x1xf32>,
    %c0_14 = arith.constant 0 : index
    %c0_15 = arith.constant 0 : index
    %39 = vector.load %arg5[%c0_14, %c0_15] : memref<2x1xf32, #tpu.memory_space<vmem>>, vector<2x1xf32>
    %40 = vector.broadcast %16 : vector<1x128xf32> to vector<2x128xf32>
    %41 = arith.mulf %40, %23 : vector<2x128xf32>
    %cst_16 = arith.constant dense<0.000000e+00> : vector<2xf32>
    %42 = vector.multi_reduction <add>, %41, %cst_16 [1] : vector<2x128xf32> to vector<2xf32>
    %43 = vector.shape_cast %42 : vector<2xf32> to vector<2x1xf32>
    %44 = arith.addf %39, %43 : vector<2x1xf32>
    %c0_17 = arith.constant 0 : index
    %c0_18 = arith.constant 0 : index
    %45 = vector.load %arg5[%c0_17, %c0_18] : memref<2x1xf32, #tpu.memory_space<vmem>>, vector<2x1xf32>
    tpu.vector_store %arg5[%c0_17, %c0_18], %44 {strides = array<i32>} : memref<2x1xf32, #tpu.memory_space<vmem>>, vector<2x1xf32>,
    %c0_19 = arith.constant 0 : index
    %c0_20 = arith.constant 0 : index
    %46 = vector.load %arg6[%c0_19, %c0_20] : memref<2x1xf32, #tpu.memory_space<vmem>>, vector<2x1xf32>
    %47 = vector.broadcast %14 : vector<1x128xf32> to vector<2x128xf32>
    %48 = arith.mulf %47, %17 : vector<2x128xf32>
    %cst_21 = arith.constant dense<0.000000e+00> : vector<2xf32>
    %49 = vector.multi_reduction <add>, %48, %cst_21 [1] : vector<2x128xf32> to vector<2xf32>
    %50 = vector.shape_cast %49 : vector<2xf32> to vector<2x1xf32>
    %51 = arith.addf %46, %50 : vector<2x1xf32>
    %c0_22 = arith.constant 0 : index
    %c0_23 = arith.constant 0 : index
    %52 = vector.load %arg6[%c0_22, %c0_23] : memref<2x1xf32, #tpu.memory_space<vmem>>, vector<2x1xf32>
    tpu.vector_store %arg6[%c0_22, %c0_23], %51 {strides = array<i32>} : memref<2x1xf32, #tpu.memory_space<vmem>>, vector<2x1xf32>,
    %c0_24 = arith.constant 0 : index
    %c0_25 = arith.constant 0 : index
    %53 = vector.load %arg7[%c0_24, %c0_25] : memref<2x1xf32, #tpu.memory_space<vmem>>, vector<2x1xf32>
    %54 = vector.broadcast %16 : vector<1x128xf32> to vector<2x128xf32>
    %55 = arith.mulf %54, %17 : vector<2x128xf32>
    %cst_26 = arith.constant dense<0.000000e+00> : vector<2xf32>
    %56 = vector.multi_reduction <add>, %55, %cst_26 [1] : vector<2x128xf32> to vector<2xf32>
    %57 = vector.shape_cast %56 : vector<2xf32> to vector<2x1xf32>
    %58 = arith.addf %53, %57 : vector<2x1xf32>
    %c0_27 = arith.constant 0 : index
    %c0_28 = arith.constant 0 : index
    %59 = vector.load %arg7[%c0_27, %c0_28] : memref<2x1xf32, #tpu.memory_space<vmem>>, vector<2x1xf32>
    tpu.vector_store %arg7[%c0_27, %c0_28], %58 {strides = array<i32>} : memref<2x1xf32, #tpu.memory_space<vmem>>, vector<2x1xf32>,
    %c0_29 = arith.constant 0 : index
    %c0_30 = arith.constant 0 : index
    %60 = vector.load %arg8[%c0_29, %c0_30] : memref<2x1xf32, #tpu.memory_space<vmem>>, vector<2x1xf32>
    %61 = vector.broadcast %14 : vector<1x128xf32> to vector<2x128xf32>
    %62 = arith.mulf %61, %22 : vector<2x128xf32>
    %cst_31 = arith.constant dense<0.000000e+00> : vector<2xf32>
    %63 = vector.multi_reduction <add>, %62, %cst_31 [1] : vector<2x128xf32> to vector<2xf32>
    %64 = vector.shape_cast %63 : vector<2xf32> to vector<2x1xf32>
    %65 = arith.addf %60, %64 : vector<2x1xf32>
    %c0_32 = arith.constant 0 : index
    %c0_33 = arith.constant 0 : index
    %66 = vector.load %arg8[%c0_32, %c0_33] : memref<2x1xf32, #tpu.memory_space<vmem>>, vector<2x1xf32>
    tpu.vector_store %arg8[%c0_32, %c0_33], %65 {strides = array<i32>} : memref<2x1xf32, #tpu.memory_space<vmem>>, vector<2x1xf32>,
    %c0_34 = arith.constant 0 : index
    %c0_35 = arith.constant 0 : index
    %67 = vector.load %arg9[%c0_34, %c0_35] : memref<2x1xf32, #tpu.memory_space<vmem>>, vector<2x1xf32>
    %68 = vector.broadcast %16 : vector<1x128xf32> to vector<2x128xf32>
    %69 = arith.mulf %68, %22 : vector<2x128xf32>
    %cst_36 = arith.constant dense<0.000000e+00> : vector<2xf32>
    %70 = vector.multi_reduction <add>, %69, %cst_36 [1] : vector<2x128xf32> to vector<2xf32>
    %71 = vector.shape_cast %70 : vector<2xf32> to vector<2x1xf32>
    %72 = arith.addf %67, %71 : vector<2x1xf32>
    %c0_37 = arith.constant 0 : index
    %c0_38 = arith.constant 0 : index
    %73 = vector.load %arg9[%c0_37, %c0_38] : memref<2x1xf32, #tpu.memory_space<vmem>>, vector<2x1xf32>
    tpu.vector_store %arg9[%c0_37, %c0_38], %72 {strides = array<i32>} : memref<2x1xf32, #tpu.memory_space<vmem>>, vector<2x1xf32>,
    %c0_39 = arith.constant 0 : index
    %c0_40 = arith.constant 0 : index
    %74 = vector.load %arg10[%c0_39, %c0_40] : memref<2x1xf32, #tpu.memory_space<vmem>>, vector<2x1xf32>
    %cst_41 = arith.constant dense<0.000000e+00> : vector<2xf32>
    %75 = vector.multi_reduction <add>, %25, %cst_41 [1] : vector<2x128xf32> to vector<2xf32>
    %76 = vector.shape_cast %75 : vector<2xf32> to vector<2x1xf32>
    %77 = arith.addf %74, %76 : vector<2x1xf32>
    %c0_42 = arith.constant 0 : index
    %c0_43 = arith.constant 0 : index
    %78 = vector.load %arg10[%c0_42, %c0_43] : memref<2x1xf32, #tpu.memory_space<vmem>>, vector<2x1xf32>
    tpu.vector_store %arg10[%c0_42, %c0_43], %77 {strides = array<i32>} : memref<2x1xf32, #tpu.memory_space<vmem>>, vector<2x1xf32>,
    %c0_44 = arith.constant 0 : index
    %c0_45 = arith.constant 0 : index
    %79 = vector.load %arg11[%c0_44, %c0_45] : memref<2x1xf32, #tpu.memory_space<vmem>>, vector<2x1xf32>
    %cst_46 = arith.constant dense<0.000000e+00> : vector<2xf32>
    %80 = vector.multi_reduction <add>, %31, %cst_46 [1] : vector<2x128xf32> to vector<2xf32>
    %81 = vector.shape_cast %80 : vector<2xf32> to vector<2x1xf32>
    %82 = arith.addf %79, %81 : vector<2x1xf32>
    %c0_47 = arith.constant 0 : index
    %c0_48 = arith.constant 0 : index
    %83 = vector.load %arg11[%c0_47, %c0_48] : memref<2x1xf32, #tpu.memory_space<vmem>>, vector<2x1xf32>
    tpu.vector_store %arg11[%c0_47, %c0_48], %82 {strides = array<i32>} : memref<2x1xf32, #tpu.memory_space<vmem>>, vector<2x1xf32>,
    %c3_i32 = arith.constant 3 : i32
    %84 = arith.cmpi eq, %arg0, %c3_i32 : i32
    %85 = arith.extui %84 : i1 to i32
    %c0_i32_49 = arith.constant 0 : i32
    %86 = arith.cmpi ne, %85, %c0_i32_49 : i32
    scf.if %86 {
      %c0_50 = arith.constant 0 : index
      %c0_51 = arith.constant 0 : index
      %87 = vector.load %arg4[%c0_50, %c0_51] : memref<2x1xf32, #tpu.memory_space<vmem>>, vector<2x1xf32>
      %c0_52 = arith.constant 0 : index
      %c0_53 = arith.constant 0 : index
      %88 = vector.load %arg6[%c0_52, %c0_53] : memref<2x1xf32, #tpu.memory_space<vmem>>, vector<2x1xf32>
      %c0_54 = arith.constant 0 : index
      %c0_55 = arith.constant 0 : index
      %89 = vector.load %arg8[%c0_54, %c0_55] : memref<2x1xf32, #tpu.memory_space<vmem>>, vector<2x1xf32>
      %90 = arith.subf %88, %87 : vector<2x1xf32>
      %91 = arith.subf %89, %87 : vector<2x1xf32>
      %cst_56 = arith.constant 1.000000e-10 : f32
      %92 = vector.broadcast %cst_56 : f32 to vector<2x1xf32>
      %93 = arith.addf %87, %92 : vector<2x1xf32>
      %cst_57 = arith.constant 6.000000e-01 : f32
      %94 = vector.broadcast %cst_57 : f32 to vector<2x1xf32>
      %95 = arith.mulf %94, %90 : vector<2x1xf32>
      %96 = arith.addf %87, %95 : vector<2x1xf32>
      %cst_58 = arith.constant 4.000000e-01 : f32
      %97 = vector.broadcast %cst_58 : f32 to vector<2x1xf32>
      %98 = arith.mulf %97, %91 : vector<2x1xf32>
      %99 = arith.addf %96, %98 : vector<2x1xf32>
      %cst_59 = arith.constant 1.000000e-10 : f32
      %100 = vector.broadcast %cst_59 : f32 to vector<2x1xf32>
      %101 = arith.addf %99, %100 : vector<2x1xf32>
      %102 = arith.divf %93, %101 : vector<2x1xf32>
      %c0_60 = arith.constant 0 : index
      %c0_61 = arith.constant 0 : index
      %103 = vector.load %arg5[%c0_60, %c0_61] : memref<2x1xf32, #tpu.memory_space<vmem>>, vector<2x1xf32>
      %c0_62 = arith.constant 0 : index
      %c0_63 = arith.constant 0 : index
      %104 = vector.load %arg7[%c0_62, %c0_63] : memref<2x1xf32, #tpu.memory_space<vmem>>, vector<2x1xf32>
      %c0_64 = arith.constant 0 : index
      %c0_65 = arith.constant 0 : index
      %105 = vector.load %arg9[%c0_64, %c0_65] : memref<2x1xf32, #tpu.memory_space<vmem>>, vector<2x1xf32>
      %106 = arith.subf %104, %103 : vector<2x1xf32>
      %107 = arith.subf %105, %103 : vector<2x1xf32>
      %cst_66 = arith.constant 1.000000e-10 : f32
      %108 = vector.broadcast %cst_66 : f32 to vector<2x1xf32>
      %109 = arith.addf %103, %108 : vector<2x1xf32>
      %cst_67 = arith.constant 6.000000e-01 : f32
      %110 = vector.broadcast %cst_67 : f32 to vector<2x1xf32>
      %111 = arith.mulf %110, %106 : vector<2x1xf32>
      %112 = arith.addf %103, %111 : vector<2x1xf32>
      %cst_68 = arith.constant 4.000000e-01 : f32
      %113 = vector.broadcast %cst_68 : f32 to vector<2x1xf32>
      %114 = arith.mulf %113, %107 : vector<2x1xf32>
      %115 = arith.addf %112, %114 : vector<2x1xf32>
      %cst_69 = arith.constant 1.000000e-10 : f32
      %116 = vector.broadcast %cst_69 : f32 to vector<2x1xf32>
      %117 = arith.addf %115, %116 : vector<2x1xf32>
      %118 = arith.divf %109, %117 : vector<2x1xf32>
      %cst_70 = arith.constant 1.000000e+00 : f32
      %119 = vector.broadcast %cst_70 : f32 to vector<2x1xf32>
      %120 = arith.subf %119, %102 : vector<2x1xf32>
      %cst_71 = arith.constant 1.000000e+00 : f32
      %121 = vector.broadcast %cst_71 : f32 to vector<2x1xf32>
      %122 = arith.subf %121, %118 : vector<2x1xf32>
      %123 = math.sqrt %122 : vector<2x1xf32>
      %124 = arith.divf %122, %123 : vector<2x1xf32>
      %125 = vector.shape_cast %120 : vector<2x1xf32> to vector<1x2x1xf32>
      %cst_72 = arith.constant dense<0.000000e+00> : vector<1xf32>
      %126 = vector.multi_reduction <add>, %125, %cst_72 [1, 2] : vector<1x2x1xf32> to vector<1xf32>
      %127 = vector.shape_cast %126 : vector<1xf32> to vector<1x1x1xf32>
      %128 = vector.extract %127[0, 0, 0] : f32 from vector<1x1x1xf32>
      %129 = vector.shape_cast %124 : vector<2x1xf32> to vector<1x2x1xf32>
      %cst_73 = arith.constant dense<0.000000e+00> : vector<1xf32>
      %130 = vector.multi_reduction <add>, %129, %cst_73 [1, 2] : vector<1x2x1xf32> to vector<1xf32>
      %131 = vector.shape_cast %130 : vector<1xf32> to vector<1x1x1xf32>
      %132 = vector.extract %131[0, 0, 0] : f32 from vector<1x1x1xf32>
      %133 = arith.addf %128, %132 : f32
      %cst_74 = arith.constant 4.000000e+00 : f32
      %134 = arith.divf %133, %cst_74 : f32
      %c0_75 = arith.constant 0 : index
      %c0_76 = arith.constant 0 : index
      %135 = vector.load %arg10[%c0_75, %c0_76] : memref<2x1xf32, #tpu.memory_space<vmem>>, vector<2x1xf32>
      %136 = vector.shape_cast %135 : vector<2x1xf32> to vector<1x2x1xf32>
      %cst_77 = arith.constant dense<0.000000e+00> : vector<1xf32>
      %137 = vector.multi_reduction <add>, %136, %cst_77 [1, 2] : vector<1x2x1xf32> to vector<1xf32>
      %138 = vector.shape_cast %137 : vector<1xf32> to vector<1x1x1xf32>
      %139 = vector.extract %138[0, 0, 0] : f32 from vector<1x1x1xf32>
      %cst_78 = arith.constant 0.000000e+00 : f32
      %140 = arith.subf %cst_78, %139 : f32
      %c0_79 = arith.constant 0 : index
      %c0_80 = arith.constant 0 : index
      %141 = vector.load %arg11[%c0_79, %c0_80] : memref<2x1xf32, #tpu.memory_space<vmem>>, vector<2x1xf32>
      %142 = vector.shape_cast %141 : vector<2x1xf32> to vector<1x2x1xf32>
      %cst_81 = arith.constant dense<0.000000e+00> : vector<1xf32>
      %143 = vector.multi_reduction <add>, %142, %cst_81 [1, 2] : vector<1x2x1xf32> to vector<1xf32>
      %144 = vector.shape_cast %143 : vector<1xf32> to vector<1x1x1xf32>
      %145 = vector.extract %144[0, 0, 0] : f32 from vector<1x1x1xf32>
      %cst_82 = arith.constant 4.000000e-01 : f32
      %146 = arith.mulf %cst_82, %145 : f32
      %cst_83 = arith.constant 6.000000e-01 : f32
      %147 = arith.mulf %cst_83, %140 : f32
      %148 = arith.addf %146, %147 : f32
      %cst_84 = arith.constant 1.024000e+03 : f32
      %149 = arith.divf %148, %cst_84 : f32
      %cst_85 = arith.constant 5.000000e-01 : f32
      %150 = arith.mulf %cst_85, %134 : f32
      %cst_86 = arith.constant 5.000000e-01 : f32
      %151 = arith.mulf %cst_86, %149 : f32
      %152 = arith.addf %150, %151 : f32
      %153 = vector.broadcast %152 : f32 to vector<1x1xf32>
      %c0_87 = arith.constant 0 : index
      %c0_88 = arith.constant 0 : index
      %154 = vector.load %arg3[%c0_87, %c0_88] : memref<1x1xf32, #tpu.memory_space<vmem>>, vector<1x1xf32>
      tpu.vector_store %arg3[%c0_87, %c0_88], %153 {strides = array<i32>} : memref<1x1xf32, #tpu.memory_space<vmem>>, vector<1x1xf32>,
    } else {
    }
    return
  }
  func.func @transform_0(%arg0: i32) -> (i32, i32) {
    %c0_i32 = arith.constant 0 : i32
    %c0_i32_0 = arith.constant 0 : i32
    return %c0_i32, %arg0 : i32, i32
  }
  func.func @transform_1(%arg0: i32) -> (i32, i32) {
    %c0_i32 = arith.constant 0 : i32
    %c0_i32_0 = arith.constant 0 : i32
    return %c0_i32, %arg0 : i32, i32
  }
  func.func @transform_2(%arg0: i32) -> (i32, i32) {
    %c0_i32 = arith.constant 0 : i32
    %c0_i32_0 = arith.constant 0 : i32
    %c0_i32_1 = arith.constant 0 : i32
    return %c0_i32, %c0_i32_0 : i32, i32
  }
}

</mosaic_0001>

<bundles_post_ra>
// kernel: tpu_custom_call.1
= control target key start
LH: loop header
LB: loop body
LE: loop exit
PB: predicated region body
PF: predicated region fallthrough
CT: control target
= control target key end

     0   :  { %7 = vsyncpa [#allocation11], 0  ;;  %s881_s0 = inlined_call_operand.hbm [shape: f32[2,512], index: 0, kind: input, shape index: {}]   ;;  %s882_s1 = inlined_call_operand.hbm [shape: f32[2,512], index: 1, kind: input, shape index: {}]   ;;  %s883_s2 = inlined_call_operand.hbm [shape: f32[1,1], index: 2, kind: output, shape index: {}]  }
   0x1   :  { %9 = vsyncpa [#allocation11 + $0x1], 0 }
   0x2   :  { %10 = vsyncpa [#allocation14], 0 }
   0x3   :  { %12 = vsyncpa [#allocation14 + $0x1], 0 }
   0x4   :  { %13 = vsyncpa [#allocation12], 0  ;;  %s699_s9 = smov 0   ;;  %s701_s10 = smov 0  }
   0x5   :  { %s703_s11 = smov 0   ;;  %s705_s12 = smov 0  }
   0x6 LB: > { %s718_s13 = sadd.s32 4294967295, %s677_s12   ;;  %s721_s14 = sadd.s32 1, %s677_s12   ;;  %s677_s12 = sphi %s705_s12, %s895_s12   ;;  %s673_s11 = sphi %s703_s11, %s894_s11   ;;  %s669_s10 = sphi %s701_s10, %s893_s10   ;;  %s665_s9 = sphi %s699_s9, %s892_s9  }
   0x7   : > { %s23_s15 = ssub.s32 %s677_s12, %s721_s14  ;;  %s26_s16 = sadd.s32 1, %s673_s11 }
   0x8   : > { %p24_p0 = scmp.eq.s32.totalorder %s23_s15, 0  ;;  %p33_p1 = scmp.ne.s32.totalorder %s673_s11, %s669_s10 }
   0x9   : > { %p34_p2 = scmp.eq.s32.totalorder %s677_s12, 0  ;;  %p39_p3 = scmp.ne.s32.totalorder %s669_s10, %s665_s9 }
   0xa   : > { %s731_s17 = scalar_select %p24_p0, %s673_s11, %s26_s16  }
   0xb   : > { %p35_p4 = por %p34_p2, %p33_p1  ;;  %p40_p5 = scmp.eq.s32.totalorder %s718_s13, 0 }
   0xc   : > { %p505_p6 = scmp.lt.s32.totalorder %s677_s12, 4  ;;  %s740_s19 = sand.u32 1, %s673_s11  }
   0xd   : > { %p735_p7 = por %p40_p5, %p39_p3  ;;  %s466_s20 = sshll.u32 %s740_s19, 1 }
   0xe   : > { %s467_s21 = sshll.u32 %s677_s12, 5  ;;  %s114_s25 = scalar_lea.vmem [#allocation10], %s466_s20 }
   0xf   : > { %s885_s18 = scalar_select %p735_p7, 1, 0 }
  0x10   : > { %s749_s24 = scalar_lea.hbm %s881_s0, %s467_s21  ;;  %s121_s26 = sshll.u32 %s114_s25, 4  ;;  %s753_s26 = int_to_ptr.vmem [resolvable:$true] %s121_s26 }
  0x11   : > { %p755_p8 = pnand %p505_p6, %p35_p4  ;;  %s111_s28 = scalar_lea.sflag [#allocation11], %s740_s19 }
  0x12   : > { %s555_s29 = scalar_lea.hbm %s749_s24, 32  ;;  %s560_s4 = scalar_lea.hbm %s881_s0, 128 }
  0x13   : > { %p556_p11 = scmp.ne.s32.totalorder %s749_s24, %s555_s29  ;;  %p557_p12 = pneg %p755_p8 }
  0x14   : > { %p561_p1 = scmp.lt.s32.totalorder %s749_s24, %s881_s0  ;;  %p562_p2 = scmp.lt.s32.totalorder %s560_s4, %s555_s29 }
  0x15   : > { %p558_p13 = pnand %p557_p12, %p556_p11 }
  0x16   : > { %p563_p3 = por %p562_p2, %p561_p1 }
  0x17   : > { %p559_p0 = pneg %p558_p13 }
  0x19   : > { %p564_p4 = pnand %p563_p3, %p559_p0 }
  0x1b   : > { %567 = shalt.err (!%p564_p4)
}
  0x1c   : > { %s568_s7 = scalar_lea.vmem %s753_s26, 32  ;;  %s679_s8 = smov [#allocation10]  }
  0x1d   : > { %p569_p5 = scmp.ne.s32.totalorder %s753_s26, %s568_s7  ;;  %s573_s9 = sshll.u32 %s679_s8, 4  ;;  %s574_s9 = int_to_ptr.vmem [resolvable:$false] %s573_s9 }
  0x1e   : > { %s575_s15 = scalar_lea.vmem %s574_s9, 64  ;;  %p576_p13 = scmp.lt.s32.totalorder %s753_s26, %s574_s9 }
  0x1f   : > { %p571_p6 = pnand %p569_p5, %p557_p12  ;;  %p577_p9 = scmp.lt.s32.totalorder %s575_s15, %s568_s7 }
  0x21   : > { %p572_p11 = pneg %p571_p6  ;;  %p578_p10 = por %p577_p9, %p576_p13 }
  0x23   : > { %p579_p1 = pnand %p578_p10, %p572_p11 }
  0x25   : > { %582 = shalt.err (!%p579_p1)
}
  0x26   : > { %501 = dma.hbm_to_vmem [thread:$0]  (!%p755_p8), %s749_s24, 32, %s753_s26, %s111_s28  }
  0x27   : > { %p887_p0 = scmp.lt.s32.totalorder %s677_s12, 5  ;;  %p888_p2 = scmp.ge.s32.totalorder %s677_s12, 1 }
  0x28   : > { %s799_s25 = scalar_lea.hbm %s882_s1, %s467_s21  ;;  %s132_s29 = scalar_lea.vmem [#allocation13], %s466_s20 }
  0x29   : > { %p790_p3 = pnand %p888_p2, %p887_p0  ;;  %s139_s30 = sshll.u32 %s132_s29, 4  ;;  %s140_s30 = int_to_ptr.vmem [resolvable:$true] %s139_s30 }
  0x2a   : > { %s129_s24 = scalar_lea.sflag [#allocation14], %s740_s19  ;;  %s583_s26 = scalar_lea.hbm %s799_s25, 32 }
  0x2b   : > { %s889_s16 = scalar_select %p790_p3, 1, 0 }
  0x2c   : > { %p584_p9 = scmp.ne.s32.totalorder %s799_s25, %s583_s26  ;;  %s588_s3 = scalar_lea.hbm %s882_s1, 128 }
  0x2d   : > { %p589_p5 = scmp.lt.s32.totalorder %s799_s25, %s882_s1  ;;  %p590_p6 = scmp.lt.s32.totalorder %s588_s3, %s583_s26 }
  0x2e   : > { %p586_p10 = pnand %p584_p9, %p557_p12 }
  0x2f   : > { %p591_p11 = por %p590_p6, %p589_p5 }
  0x30   : > { %p587_p4 = pneg %p586_p10 }
  0x32   : > { %p592_p13 = pnand %p591_p11, %p587_p4 }
  0x34   : > { %595 = shalt.err (!%p592_p13)
}
  0x35   : > { %s596_s20 = scalar_lea.vmem %s140_s30, 32  ;;  %s680_s19 = smov [#allocation13]  }
  0x36   : > { %p597_p1 = scmp.ne.s32.totalorder %s140_s30, %s596_s20  ;;  %s601_s5 = sshll.u32 %s680_s19, 4  ;;  %s602_s5 = int_to_ptr.vmem [resolvable:$false] %s601_s5 }
  0x37   : > { %s603_s6 = scalar_lea.vmem %s602_s5, 64  ;;  %p604_p9 = scmp.lt.s32.totalorder %s140_s30, %s602_s5 }
  0x38   : > { %p599_p0 = pnand %p597_p1, %p557_p12  ;;  %p605_p10 = scmp.lt.s32.totalorder %s603_s6, %s596_s20 }
  0x3a   : > { %p600_p2 = pneg %p599_p0  ;;  %p606_p7 = por %p605_p10, %p604_p9 }
  0x3c   : > { %p607_p3 = pnand %p606_p7, %p600_p2 }
  0x3e   : > { %610 = shalt.err (!%p607_p3)
}
  0x3f   : > { %504 = dma.hbm_to_vmem [thread:$0]  (!%p755_p8), %s799_s25, 32, %s140_s30, %s129_s24  }
  0x40   : > { %p890_p4 = scmp.ne.s32.totalorder %s889_s16, 0 }
  0x41   : > { %s150_s7 = sand.u32 (!%p890_p4), 1, %s669_s10   ;;  %p891_p12 = scmp.ne.s32.totalorder (!%p890_p4), %s885_s18, 0 }
  0x42   : > { %148 = sbr.rel (%p890_p4) target bundleno = 550 (0x226), region = 28  ;;  %s471_s8 = sshll.u32 (!%p890_p4), %s150_s7, 1 }
  0x43   : > { %s151_s9 = scalar_lea.sflag (!%p890_p4), [#allocation11], %s150_s7  ;;  %s154_s15 = scalar_lea.vmem (!%p890_p4), [#allocation10], %s471_s8 }
  0x47   : > { %652 = dma.done.wait (%p891_p12), %s151_s9, 32  }
  0x48   : > { %654 = vsyncadd (%p891_p12), %s151_s9, 4294967264  ;;  %s160_s22 = scalar_lea.sflag [#allocation14], %s150_s7  ;;  %s163_s23 = scalar_lea.vmem [#allocation13], %s471_s8 }
  0x49   : > { %656 = dma.done.wait (%p891_p12), %s160_s22, 32  }
  0x4a   : > { %658 = vsyncadd (%p891_p12), %s160_s22, 4294967264  ;;  %p473_p7 = scmp.ne.s32.totalorder %s718_s13, 0 }
  0x4c   : > { %187 = sbr.rel (%p473_p7) target bundleno = 86 (0x56), region = 40 }
  0x51   : > { %vm188_vm0 = vcmask 1024   ;;  %v681_v0 = vmov 0.0  }
  0x52   : > { %189 = vst.msk [vmem:[#allocation2] sm:$0x3] %vm188_vm0, %v681_v0  ;;  %190 = vst.msk [vmem:[#allocation3] sm:$0x3] %vm188_vm0, %v681_v0 }
  0x53   : > { %191 = vst.msk [vmem:[#allocation4] sm:$0x3] %vm188_vm0, %v681_v0  ;;  %192 = vst.msk [vmem:[#allocation5] sm:$0x3] %vm188_vm0, %v681_v0 }
  0x54   : > { %193 = vst.msk [vmem:[#allocation6] sm:$0x3] %vm188_vm0, %v681_v0  ;;  %194 = vst.msk [vmem:[#allocation7] sm:$0x3] %vm188_vm0, %v681_v0 }
  0x55   : > { %195 = vst.msk [vmem:[#allocation8] sm:$0x3] %vm188_vm0, %v681_v0  ;;  %196 = vst.msk [vmem:[#allocation9] sm:$0x3] %vm188_vm0, %v681_v0 }
  0x56 PF: > { %v197_v1 = vlaneseq  ;;  %s474_s27 = sshll.u32 %s718_s13, 7  ;;  %v210_v3 = vld [vmem:[%s163_s23] sm:$0x3]  ;;  %v209_v6 = vld [vmem:[%s154_s15] sm:$0x3]  ;;  %v682_v12 = vmov 0.0  }
  0x57   : > { %v200_v2 = vstv %s474_s27  ;;  %v211_v5 = vmax.f32 %v210_v3, 1e-10  ;;  %vm229_vm3 = vcmask 1041408   ;;  %vm234_vm6 = vcmask 1024   ;;  %p477_p8 = scmp.ne.s32.totalorder %s718_s13, 3 }
  0x58   : > { %v198_v4 = vand.u32 127, %v197_v1 }
  0x59   : > { %v212_v8 = vmin.f32 %v211_v5, 1.0  ;;  %v227_v40 = vld [vmem:[#allocation2] sm:$0x3]  ;;  %v236_v46 = vld [vmem:[#allocation3] sm:$0x3] }
  0x5a   : > { %v201_v7 = vadd.s32 %v200_v2, %v198_v4  ;;  %v243_v39 = vld [vmem:[#allocation4] sm:$0x3]  ;;  %v250_v45 = vld [vmem:[#allocation5] sm:$0x3] }
  0x5b   : > { %v213_v10 = vmul.f32 %v212_v8, %v209_v6  ;;  %543 = vlog2.f32 %v212_v8  ;;  %v217_v11 = vsub.f32 1.0, %v212_v8  ;;  %v264_v51 = vld [vmem:[#allocation7] sm:$0x3]  ;;  %v257_v52 = vld [vmem:[#allocation6] sm:$0x3] }
  0x5c   : > { %v202_v9 = vand.u32 1, %v201_v7  ;;  %v271_v57 = vld [vmem:[#allocation8] sm:$0x3]  ;;  %v277_v60 = vld [vmem:[#allocation9] sm:$0x3] }
  0x5d   : > { %545 = vrsqrt.f32 %v217_v11  ;;  %vm220_vm4 = vcmp.eq.f32.partialorder %v217_v11, inf  ;;  %v223_v30 = vand.u32 2147483648, %v217_v11  ;;  %vm222_vm5 = vcmp.eq.f32.partialorder %v217_v11, 0.0 }
  0x5e   : > { %vm203_vm1 = vcmp.eq.s32.totalorder %v202_v9, 0  ;;  %vm204_vm2 = vcmp.eq.s32.totalorder %v202_v9, 1 }
  0x5f   : > { %v475_v13 = vsel %vm203_vm1, 1.0, %v682_v12  ;;  %v476_v14 = vsel %vm204_vm2, 1.0, %v682_v12 }
  0x60   : > { %v244_v15 = vmul.f32 %v475_v13, %v209_v6  ;;  %v228_v16 = vmul.f32 %v475_v13, %v213_v10  ;;  %v251_v17 = vmul.f32 %v476_v14, %v209_v6  ;;  %v237_v18 = vmul.f32 %v476_v14, %v213_v10 }
  0x61   : > { %v265_v23 = vmul.f32 %v476_v14, %v212_v8  ;;  %v258_v24 = vmul.f32 %v475_v13, %v212_v8 }
  0x62   : > { %v245_v19 = vsel %vm229_vm3, %v244_v15, 0.0  ;;  %v230_v20 = vsel %vm229_vm3, %v228_v16, 0.0  ;;  %v252_v21 = vsel %vm229_vm3, %v251_v17, 0.0  ;;  %v238_v22 = vsel %vm229_vm3, %v237_v18, 0.0 }
  0x63   : > { %246 = vadd.xlane.f32.xlu1 %v245_v19  ;;  %231 = vadd.xlane.f32.xlu0 %v230_v20  ;;  %v266_v25 = vsel %vm229_vm3, %v265_v23, 0.0  ;;  %v259_v26 = vsel %vm229_vm3, %v258_v24, 0.0 }
  0x67   : > { %253 = vadd.xlane.f32.xlu1 %v252_v21  ;;  %239 = vadd.xlane.f32.xlu0 %v238_v22 }
  0x68   : > { %v544_v27 = vpop.eup %543 }
  0x69   : > { %v215_v28 = vmul.f32 0.6931472, %v544_v27 }
  0x6a   : > { %v546_v29 = vpop.eup %545 }
  0x6b   : > { %267 = vadd.xlane.f32.xlu1 %v266_v25  ;;  %260 = vadd.xlane.f32.xlu0 %v259_v26  ;;  %v216_v31 = vmul.f32 %v215_v28, %v209_v6  ;;  %v219_v32 = vmul.f32 %v546_v29, %v217_v11 }
  0x6d   : > { %v221_v33 = vsel %vm220_vm4, %v217_v11, %v219_v32  ;;  %v225_v34 = vadd.f32 1.0, %v216_v31  ;;  %v272_v35 = vsel %vm229_vm3, %v216_v31, 0.0 }
  0x6e   : > { %v224_v36 = vsel %vm222_vm5, %v223_v30, %v221_v33 }
  0x6f   : > { %273 = vadd.xlane.f32.xlu0 %v272_v35  ;;  %v226_v37 = vmul.f32 %v225_v34, %v224_v36 }
  0x71   : > { %v278_v38 = vsel %vm229_vm3, %v226_v37, 0.0 }
  0x72   : > { %279 = vadd.xlane.f32.xlu1 %v278_v38 }
  0xec   : > { %v247_v41 = vpop.xlane.xlu1 %246  ;;  %v232_v42 = vpop.xlane.xlu0 %231 }
  0xed   : > { %v248_v43 = vadd.f32 %v247_v41, %v243_v39  ;;  %v233_v44 = vadd.f32 %v232_v42, %v227_v40 }
  0xef   : > { %249 = vst.msk [vmem:[#allocation4] sm:$0x3] %vm234_vm6, %v248_v43  ;;  %235 = vst.msk [vmem:[#allocation2] sm:$0x3] %vm234_vm6, %v233_v44 }
  0xf0   : > { %v254_v47 = vpop.xlane.xlu1 %253  ;;  %v240_v48 = vpop.xlane.xlu0 %239 }
  0xf1   : > { %v255_v49 = vadd.f32 %v254_v47, %v250_v45  ;;  %v241_v50 = vadd.f32 %v240_v48, %v236_v46 }
  0xf3   : > { %256 = vst.msk [vmem:[#allocation5] sm:$0x3] %vm234_vm6, %v255_v49  ;;  %242 = vst.msk [vmem:[#allocation3] sm:$0x3] %vm234_vm6, %v241_v50 }
  0xf4   : > { %v268_v53 = vpop.xlane.xlu1 %267  ;;  %v261_v54 = vpop.xlane.xlu0 %260 }
  0xf5   : > { %v269_v55 = vadd.f32 %v268_v53, %v264_v51  ;;  %v262_v56 = vadd.f32 %v261_v54, %v257_v52 }
  0xf7   : > { %270 = vst.msk [vmem:[#allocation7] sm:$0x3] %vm234_vm6, %v269_v55  ;;  %263 = vst.msk [vmem:[#allocation6] sm:$0x3] %vm234_vm6, %v262_v56 }
  0xf8   : > { %v274_v58 = vpop.xlane.xlu0 %273 }
  0xf9   : > { %v275_v59 = vadd.f32 %v274_v58, %v271_v57 }
  0xfa   : > { %286 = sbr.rel (%p477_p8) target bundleno = 535 (0x217), region = 44 }
  0xfb   : > { %276 = vst.msk [vmem:[#allocation8] sm:$0x3] %vm234_vm6, %v275_v59  ;;  %v280_v61 = vpop.xlane.xlu1 %279 }
  0xfc   : > { %v281_v62 = vadd.f32 %v280_v61, %v277_v60 }
  0xfe   : > { %282 = vst.msk [vmem:[#allocation9] sm:$0x3] %vm234_vm6, %v281_v62 }
  0xff   : > { %v287_v63 = vld [vmem:[#allocation2] sm:$0x3]  ;;  %v288_v0 = vld [vmem:[#allocation4] sm:$0x3]  ;;  %v289_v1 = vld [vmem:[#allocation6] sm:$0x3] }
 0x100   : > { %v290_v2 = vsub.f32 %v288_v0, %v287_v63  ;;  %v291_v3 = vsub.f32 %v289_v1, %v287_v63  ;;  %v300_v7 = vld [vmem:[#allocation3] sm:$0x3]  ;;  %v301_v8 = vld [vmem:[#allocation5] sm:$0x3]  ;;  %v302_v11 = vld [vmem:[#allocation7] sm:$0x3] }
 0x101   : > { %v303_v12 = vsub.f32 %v301_v8, %v300_v7  ;;  %v304_v14 = vsub.f32 %v302_v11, %v300_v7  ;;  %v292_v23 = vadd.f32 1e-10, %v287_v63  ;;  %v305_v24 = vadd.f32 1e-10, %v300_v7 }
 0x102   : > { %v348_v4 = vld [vmem:[#allocation8] sm:$0x3]  ;;  %v293_v9 = vmul.f32 0.6, %v290_v2  ;;  %v295_v10 = vmul.f32 0.4, %v291_v3 }
 0x103   : > { %v349_v6 = vsel %vm234_vm6, %v348_v4, 0.0  ;;  %v306_v16 = vmul.f32 0.6, %v303_v12  ;;  %v308_v17 = vmul.f32 0.4, %v304_v14  ;;  %vm381_vm9 = vcmask 0  }
 0x104   : > { %350 = vadd.xlane.f32.xlu1 %v349_v6  ;;  %v294_v15 = vadd.f32 %v293_v9, %v287_v63 }
 0x105   : > { %v360_v5 = vld [vmem:[#allocation9] sm:$0x3]  ;;  %v307_v19 = vadd.f32 %v306_v16, %v300_v7 }
 0x106   : > { %v361_v13 = vsel %vm234_vm6, %v360_v5, 0.0  ;;  %v296_v18 = vadd.f32 %v295_v10, %v294_v15 }
 0x107   : > { %v309_v21 = vadd.f32 %v308_v17, %v307_v19 }
 0x108   : > { %362 = vadd.xlane.f32.xlu1 %v361_v13  ;;  %v297_v20 = vadd.f32 1e-10, %v296_v18 }
 0x109   : > { %v310_v22 = vadd.f32 1e-10, %v309_v21 }
 0x10a   : > { %547 = vrcp.f32 %v297_v20 }
 0x10b   : > { %549 = vrcp.f32 %v310_v22 }
 0x117   : > { %v548_v25 = vpop.eup %547 }
 0x118   : > { %v299_v26 = vmul.f32 %v548_v25, %v292_v23  ;;  %v550_v27 = vpop.eup %549 }
 0x119   : > { %v312_v29 = vmul.f32 %v550_v27, %v305_v24 }
 0x11a   : > { %v313_v28 = vsub.f32 1.0, %v299_v26 }
 0x11b   : > { %v314_v31 = vsub.f32 1.0, %v312_v29 }
 0x11c   : > { %v324_v30 = vsel %vm234_vm6, %v313_v28, 0.0 }
 0x11d   : > { %325 = vadd.xlane.f32.xlu0 %v324_v30  ;;  %551 = vrsqrt.f32 %v314_v31  ;;  %vm317_vm7 = vcmp.eq.f32.partialorder %v314_v31, inf  ;;  %v320_v33 = vand.u32 2147483648, %v314_v31  ;;  %vm319_vm8 = vcmp.eq.f32.partialorder %v314_v31, 0.0 }
 0x12a   : > { %v552_v32 = vpop.eup %551 }
 0x12b   : > { %v316_v34 = vmul.f32 %v552_v32, %v314_v31 }
 0x12d   : > { %v318_v35 = vsel %vm317_vm7, %v314_v31, %v316_v34 }
 0x12e   : > { %v321_v36 = vsel %vm319_vm8, %v320_v33, %v318_v35 }
 0x12f   : > { %553 = vrcp.f32 %v321_v36 }
 0x13c   : > { %v554_v37 = vpop.eup %553 }
 0x13d   : > { %v323_v38 = vmul.f32 %v554_v37, %v314_v31 }
 0x13f   : > { %v334_v39 = vsel %vm234_vm6, %v323_v38, 0.0 }
 0x140   : > { %335 = vadd.xlane.f32.xlu0 %v334_v39 }
 0x18d   : > { %v351_v47 = vpop.xlane.xlu1 %350 }
 0x18e   : > { %v352_v49 = vrot.slane %v351_v47, 4 }
 0x190   : > { %v353_v51 = vadd.f32 %v352_v49, %v351_v47 }
 0x191   : > { %v363_v48 = vpop.xlane.xlu1 %362 }
 0x192   : > { %v364_v50 = vrot.slane %v363_v48, 4  ;;  %v354_v53 = vrot.slane %v353_v51, 2 }
 0x194   : > { %v365_v52 = vadd.f32 %v364_v50, %v363_v48  ;;  %v355_v58 = vadd.f32 %v354_v53, %v353_v51 }
 0x196   : > { %v366_v55 = vrot.slane %v365_v52, 2  ;;  %v356_v62 = vrot.slane %v355_v58, 1 }
 0x198   : > { %v367_v59 = vadd.f32 %v366_v55, %v365_v52  ;;  %v357_v2 = vadd.f32 %v356_v62, %v355_v58 }
 0x19a   : > { %v368_v0 = vrot.slane %v367_v59, 1 }
 0x19c   : > { %v369_v3 = vadd.f32 %v368_v0, %v367_v59 }
 0x1a6   : > { %v326_v40 = vpop.xlane.xlu0 %325 }
 0x1a7   : > { %v327_v41 = vrot.slane %v326_v40, 4 }
 0x1a9   : > { %v328_v42 = vadd.f32 %v327_v41, %v326_v40 }
 0x1ab   : > { %v329_v43 = vrot.slane %v328_v42, 2 }
 0x1ad   : > { %v330_v44 = vadd.f32 %v329_v43, %v328_v42 }
 0x1af   : > { %v331_v45 = vrot.slane %v330_v44, 1 }
 0x1b1   : > { %v332_v46 = vadd.f32 %v331_v45, %v330_v44 }
 0x1b3   : > { %482 = vpush %v332_v46 }
 0x1c9   : > { %v336_v54 = vpop.xlane.xlu0 %335 }
 0x1ca   : > { %v337_v56 = vrot.slane %v336_v54, 4 }
 0x1cc   : > { %v338_v57 = vadd.f32 %v337_v56, %v336_v54 }
 0x1ce   : > { %v339_v60 = vrot.slane %v338_v57, 2 }
 0x1d0   : > { %v340_v61 = vadd.f32 %v339_v60, %v338_v57 }
 0x1d2   : > { %v341_v63 = vrot.slane %v340_v61, 1 }
 0x1d4   : > { %v342_v1 = vadd.f32 %v341_v63, %v340_v61 }
 0x1d6   : > { %484 = vpush %v342_v1 }
 0x1d7   : > { %486 = vpush %v357_v2 }
 0x1d8   : > { %488 = vpush %v369_v3 }
 0x1e4   : > { %s483_s18 = spop %482 }
 0x207   : > { %s485_s16 = spop %484 }
 0x208   : > { %s487_s25 = spop %486  ;;  %s344_s30 = sadd.f32 %s485_s16, %s483_s18 }
 0x209   : > { %s359_s29 = ssub.f32 0.0, %s487_s25  ;;  %s489_s24 = spop %488 }
 0x20a   : > { %s371_s12 = smul.f32 0.4, %s489_s24 }
 0x20b   : > { %s372_s26 = smul.f32 0.6, %s359_s29 }
 0x20c   : > { %s347_s28 = smul.f32 0.25, %s344_s30 }
 0x20d   : > { %s373_s3 = sadd.f32 %s372_s26, %s371_s12 }
 0x20e   : > { %s377_s4 = smul.f32 0.5, %s347_s28 }
 0x20f   : > { %s376_s21 = smul.f32 0.0009765625, %s373_s3 }
 0x211   : > { %s378_s20 = smul.f32 0.5, %s376_s21 }
 0x213   : > { %s379_s19 = sadd.f32 %s378_s20, %s377_s4 }
 0x215   : > { %v380_v4 = vstv %s379_s19 }
 0x216   : > { %382 = vst.msk [vmem:[#allocation15] sm:$0x1] %vm381_vm9, %v380_v4 }
 0x217 PF: > { %p506_p3 = scmp.eq.s32.totalorder %s718_s13, 3  ;;  %s683_s5 = smov [#allocation15]  }
 0x218   : > { %s390_s6 = sshll.u32 %s683_s5, 4  ;;  %s391_s6 = int_to_ptr.vmem [resolvable:$true] %s390_s6 }
 0x219   : > { %s611_s7 = scalar_lea.vmem %s391_s6, 16  ;;  %s617_s8 = scalar_lea.vmem %s391_s6, 32 }
 0x21a   : > { %p612_p5 = scmp.ne.s32.totalorder %s391_s6, %s611_s7  ;;  %p618_p13 = scmp.lt.s32.totalorder %s391_s6, %s391_s6 }
 0x21b   : > { %p619_p1 = scmp.lt.s32.totalorder %s617_s8, %s611_s7 }
 0x21c   : > { %p613_p6 = pnand %p612_p5, %p506_p3 }
 0x21d   : > { %p620_p0 = por %p619_p1, %p618_p13 }
 0x21e   : > { %p614_p11 = pneg %p613_p6 }
 0x220   : > { %p621_p2 = pnand %p620_p0, %p614_p11 }
 0x222   : > { %624 = shalt.err (!%p621_p2)
}
 0x223   : > { %495 = dma.vmem_to_hbm [thread:$0]  (%p506_p3), %s391_s6, 16, %s883_s2, [#allocation12]  }
 0x224   : > { %660 = dma.done.wait (%p506_p3), [#allocation12], 16  }
 0x225   : > { %662 = vsyncadd (%p506_p3), [#allocation12], 4294967280 }
 0x226 PF: > { %p16_p9 = scmp.ge.s32.totalorder %s721_s14, 6   ;;  %s892_s9 = smov %s669_s10 }
 0x227   : > { %s893_s10 = smov %s673_s11  ;;  %s894_s11 = smov %s731_s17 }
 0x228   : > { %s895_s12 = smov %s721_s14  ;;  %18 = sbr.rel (!%p16_p9) target bundleno = 6 (0x6), region = 86 }
 0x22d   :  { %403 = vsyncpa [#allocation11], 1 }
 0x22e   :  { %405 = vsyncpa [#allocation11 + $0x1], 1 }
 0x22f   :  { %406 = vsyncpa [#allocation14], 1 }
 0x230   :  { %408 = vsyncpa [#allocation14 + $0x1], 1 }
 0x231   :  { %409 = vsyncpa [#allocation12], 1 }
 0x232   :  { %411 = vsyncpa [#allocation12 + $0x1], 1 }

</bundles_post_ra>
